<compile_context>
chip_gen: v6e
topology: v6e:2x2x1
jax: 0.10.0
libtpu: 0.0.40
codegen_flags: <defaults>
</compile_context>

<pallas_src>
import jax
import jax.numpy as jnp
from jax.experimental import pallas as pl
from jax.experimental.pallas import tpu as pltpu


def _round_up(x, m):
    return ((x + m - 1) // m) * m


def _make_kernel(H, separate_values):
    def kernel(q_ref, k_ref, *rest):
        if separate_values:
            v_ref, wq_ref, woc_ref, wc_ref, cqm_ref, ap_ref = rest
        else:
            wq_ref, woc_ref, wc_ref, cqm_ref, ap_ref = rest

        q = q_ref[...].astype(jnp.float32)          # [TB, H]
        keys = k_ref[...].astype(jnp.float32)       # [TB, L, H]
        values = v_ref[...].astype(jnp.float32) if separate_values else keys

        # Fused query-side projection: [TB,H] @ [H,2H] -> [TB,2H]
        #   cols [:H]  -> decoder_hidden = in_projection(query)
        #   cols [H:]  -> query @ W_out[:, H:2H].T (query half of out_projection)
        qp = jnp.dot(q, wq_ref[...], preferred_element_type=jnp.float32)
        dh = qp[:, :H]                               # [TB, H]
        q_out = qp[:, H:]                            # [TB, H]

        # scores[b, l] = sum_h keys[b, l, h] * dh[b, h]   (VPU mul + lane reduce)
        scores = jnp.sum(keys * dh[:, None, :], axis=-1)        # [TB, L]

        # softmax over length (nn.Softmax on a 2-D input -> dim=1)
        m = jnp.max(scores, axis=-1, keepdims=True)
        e = jnp.exp(scores - m)
        inv = pl.reciprocal(jnp.sum(e, axis=-1, keepdims=True), approx=True)
        probs = e * inv                                           # [TB, L]

        # weighted_context[b, h] = sum_l probs[b, l] * values[b, l, h]
        wc = jnp.sum(probs[:, :, None] * values, axis=1)          # [TB, H]

        # tanh(out_projection(cat(weighted_context, query)))
        mixed = jnp.dot(wc, woc_ref[...], preferred_element_type=jnp.float32) + q_out
        out = jnp.tanh(mixed)

        wc_ref[...] = wc.astype(wc_ref.dtype)
        cqm_ref[...] = out.astype(cqm_ref.dtype)
        ap_ref[...] = probs.astype(ap_ref.dtype)

    return kernel


def bilinear_attention(query, keys, w_in, w_out, values=None):
    """query: [B,H], keys: [B,L,H], w_in: [H,H] (nn.Linear weight), w_out: [H,2H].
       values: optional [B,L,H] (defaults to keys, reused without a second DMA stream).
       Returns (weighted_context [B,H], context_query_mixed [B,H], attn_probs [B,L])."""
    B, H = query.shape
    L = keys.shape[1]
    separate_values = values is not None
    out_dtype = query.dtype

    # ---- weight prep (host side, cheap XLA ops) ----
    w_in_t = w_in.T                                         # [H, H]
    w_out_t = w_out.T                                       # [2H, H]
    w_out_ctx = w_out_t[:H]                                 # [H, H]  (applied to weighted_context)
    w_out_q = w_out_t[H:]                                   # [H, H]  (applied to query)
    w_q_fused = jnp.concatenate([w_in_t, w_out_q], axis=1)  # [H, 2H]

    # ---- batch tile selection (VMEM-aware; multiple of 8 sublanes) ----
    n_kv = 2 if separate_values else 1
    bytes_per_row = 4 * (H + n_kv * L * H + 2 * H + L)      # streamed f32 bytes per batch row
    vmem_budget = 24 * 1024 * 1024                          # double-buffered streams stay well under
    tb_cap = max(8, (vmem_budget // (2 * bytes_per_row)) // 8 * 8)
    TB = min(256, _round_up(B, 8), tb_cap)
    B_pad = _round_up(B, TB)
    # Prefer >= 2 grid steps (v7x has 2 TensorCores) when it adds no extra padding.
    if B_pad // TB < 2 and TB >= 16:
        half = (TB // 2) // 8 * 8
        if half >= 8 and _round_up(B, half) == B_pad:
            TB = half

    if B_pad != B:
        pad = B_pad - B
        query = jnp.pad(query, ((0, pad), (0, 0)))
        keys = jnp.pad(keys, ((0, pad), (0, 0), (0, 0)))
        if separate_values:
            values = jnp.pad(values, ((0, pad), (0, 0), (0, 0)))

    grid = (B_pad // TB,)

    in_specs = [
        pl.BlockSpec((TB, H), lambda i: (i, 0)),            # query
        pl.BlockSpec((TB, L, H), lambda i: (i, 0, 0)),      # keys
    ]
    args = [query, keys]
    if separate_values:
        in_specs.append(pl.BlockSpec((TB, L, H), lambda i: (i, 0, 0)))
        args.append(values)
    in_specs += [
        pl.BlockSpec((H, 2 * H), lambda i: (0, 0)),         # [W_in^T | W_out_q^T]
        pl.BlockSpec((H, H), lambda i: (0, 0)),             # W_out_ctx^T
    ]
    args += [w_q_fused, w_out_ctx]

    out_shapes = (
        jax.ShapeDtypeStruct((B_pad, H), out_dtype),        # weighted_context
        jax.ShapeDtypeStruct((B_pad, H), out_dtype),        # context_query_mixed
        jax.ShapeDtypeStruct((B_pad, L), out_dtype),        # attn_probs
    )
    out_specs = [
        pl.BlockSpec((TB, H), lambda i: (i, 0)),
        pl.BlockSpec((TB, H), lambda i: (i, 0)),
        pl.BlockSpec((TB, L), lambda i: (i, 0)),
    ]

    cost = pl.CostEstimate(
        flops=int(B_pad * (6 * H * H + 4 * L * H)),
        transcendentals=int(B_pad * (L + H + 1)),
        bytes_accessed=int(4 * (B_pad * (H + n_kv * L * H + 2 * H + L) + 3 * H * H)),
    )

    wc, cqm, probs = pl.pallas_call(
        _make_kernel(H, separate_values),
        out_shape=out_shapes,
        grid_spec=pltpu.PrefetchScalarGridSpec(
            num_scalar_prefetch=0,
            grid=grid,
            in_specs=in_specs,
            out_specs=out_specs,
        ),
        compiler_params=pltpu.CompilerParams(
            dimension_semantics=("parallel",),
            vmem_limit_bytes=48 * 1024 * 1024,
        ),
        cost_estimate=cost,
    )(*args)

    if B_pad != B:
        wc, cqm, probs = wc[:B], cqm[:B], probs[:B]
    return wc, cqm, probs


def _reference(query, keys, w_in, w_out, values=None):
    if values is None:
        values = keys
    dh = query @ w_in.T                                     # [B, H]
    scores = jnp.einsum("blh,bh->bl", keys, dh)             # [B, L]
    probs = jax.nn.softmax(scores, axis=1)
    wc = jnp.einsum("bl,blh->bh", probs, values)            # [B, H]
    mixed = jnp.tanh(jnp.concatenate([wc, query], axis=1) @ w_out.T)
    return wc, mixed, probs


if __name__ == "__main__":
    B, L, H = 2, 8, 32

    key = jax.random.PRNGKey(0)
    k1, k2, k3, k4, k5 = jax.random.split(key, 5)

    query = jax.random.normal(k1, (B, H), dtype=jnp.float32)
    keys = jax.random.normal(k2, (B, L, H), dtype=jnp.float32)
    bound = 1.0 / (H ** 0.5)
    w_in = jax.random.uniform(k3, (H, H), minval=-bound, maxval=bound, dtype=jnp.float32)
    bound2 = 1.0 / ((2 * H) ** 0.5)
    w_out = jax.random.uniform(k4, (H, 2 * H), minval=-bound2, maxval=bound2, dtype=jnp.float32)
    values = jax.random.normal(k5, (B, L, H), dtype=jnp.float32)

    # Path 1: values=None (keys reused inside the kernel, single KV stream).
    wc, cqm, probs = bilinear_attention(query, keys, w_in, w_out)
    jax.block_until_ready((wc, cqm, probs))
    wc_r, cqm_r, probs_r = _reference(query, keys, w_in, w_out)
    # approx reciprocal in the softmax -> relaxed tolerance vs. the exact reference.
    assert jnp.allclose(wc, wc_r, atol=2e-3, rtol=2e-3)
    assert jnp.allclose(cqm, cqm_r, atol=2e-3, rtol=2e-3)
    assert jnp.allclose(probs, probs_r, atol=2e-3, rtol=2e-3)

    # Path 2: explicit values tensor.
    wc2, cqm2, probs2 = bilinear_attention(query, keys, w_in, w_out, values=values)
    jax.block_until_ready((wc2, cqm2, probs2))
    wc2_r, cqm2_r, probs2_r = _reference(query, keys, w_in, w_out, values=values)
    assert jnp.allclose(wc2, wc2_r, atol=2e-3, rtol=2e-3)
    assert jnp.allclose(cqm2, cqm2_r, atol=2e-3, rtol=2e-3)
    assert jnp.allclose(probs2, probs2_r, atol=2e-3, rtol=2e-3)

    print("KERNEL_OK")
</pallas_src>

<mosaic_0001>
module attributes {stable_mosaic.version = 11 : i64} {
  func.func @kernel(%arg0: i32, %arg1: memref<8x32xf32, #tpu.memory_space<vmem>>, %arg2: memref<8x8x32xf32, #tpu.memory_space<vmem>>, %arg3: memref<32x64xf32, #tpu.memory_space<vmem>>, %arg4: memref<32x32xf32, #tpu.memory_space<vmem>>, %arg5: memref<8x32xf32, #tpu.memory_space<vmem>>, %arg6: memref<8x32xf32, #tpu.memory_space<vmem>>, %arg7: memref<8x8xf32, #tpu.memory_space<vmem>>) attributes {dimension_semantics = [#tpu.dimension_semantics<parallel>], iteration_bounds = array<i64: 1>, scalar_prefetch = 0 : i64, scratch_operands = 0 : i64, tpu.core_type = #tpu.core_type<tc>, window_params = [{transform_indices = @transform_0, window_bounds = array<i64: 8, 32>}, {transform_indices = @transform_1, window_bounds = array<i64: 8, 8, 32>}, {pipeline_mode = #tpu.pipeline_mode<synchronous>, transform_indices = @transform_2, window_bounds = array<i64: 32, 64>}, {pipeline_mode = #tpu.pipeline_mode<synchronous>, transform_indices = @transform_3, window_bounds = array<i64: 32, 32>}, {transform_indices = @transform_4, window_bounds = array<i64: 8, 32>}, {transform_indices = @transform_5, window_bounds = array<i64: 8, 32>}, {transform_indices = @transform_6, window_bounds = array<i64: 8, 8>}]} {
    %c0 = arith.constant 0 : index
    %c0_0 = arith.constant 0 : index
    %0 = vector.load %arg1[%c0, %c0_0] : memref<8x32xf32, #tpu.memory_space<vmem>>, vector<8x32xf32>
    %c0_1 = arith.constant 0 : index
    %c0_2 = arith.constant 0 : index
    %c0_3 = arith.constant 0 : index
    %1 = vector.load %arg2[%c0_1, %c0_2, %c0_3] : memref<8x8x32xf32, #tpu.memory_space<vmem>>, vector<8x8x32xf32>
    %c0_4 = arith.constant 0 : index
    %c0_5 = arith.constant 0 : index
    %2 = vector.load %arg3[%c0_4, %c0_5] : memref<32x64xf32, #tpu.memory_space<vmem>>, vector<32x64xf32>
    %cst = arith.constant dense<0.000000e+00> : vector<8x64xf32>
    %3 = tpu.matmul %0, %2, %cst {dimension_numbers = #tpu.dot_dimension_numbers<[1], [0], [0], [1], [0, 0, 1, 1], [], []>} : vector<8x32xf32>, vector<32x64xf32>, vector<8x64xf32> -> vector<8x64xf32>
    %4 = vector.extract_strided_slice %3 {offsets = [0, 0], sizes = [8, 32], strides = [1, 1]} : vector<8x64xf32> to vector<8x32xf32>
    %5 = vector.extract_strided_slice %3 {offsets = [0, 32], sizes = [8, 32], strides = [1, 1]} : vector<8x64xf32> to vector<8x32xf32>
    %6 = vector.shape_cast %4 : vector<8x32xf32> to vector<8x1x32xf32>
    %7 = vector.broadcast %6 : vector<8x1x32xf32> to vector<8x8x32xf32>
    %8 = arith.mulf %1, %7 : vector<8x8x32xf32>
    %cst_6 = arith.constant dense<0.000000e+00> : vector<8x8xf32>
    %9 = vector.multi_reduction <add>, %8, %cst_6 [2] : vector<8x8x32xf32> to vector<8x8xf32>
    %cst_7 = arith.constant dense<0xFF800000> : vector<8xf32>
    %10 = vector.multi_reduction <maximumf>, %9, %cst_7 [1] : vector<8x8xf32> to vector<8xf32>
    %11 = vector.shape_cast %10 : vector<8xf32> to vector<8x1xf32>
    %12 = vector.broadcast %11 : vector<8x1xf32> to vector<8x8xf32>
    %13 = arith.subf %9, %12 : vector<8x8xf32>
    %14 = math.exp %13 : vector<8x8xf32>
    %cst_8 = arith.constant dense<0.000000e+00> : vector<8xf32>
    %15 = vector.multi_reduction <add>, %14, %cst_8 [1] : vector<8x8xf32> to vector<8xf32>
    %16 = vector.shape_cast %15 : vector<8xf32> to vector<8x1xf32>
    %17 = tpu.reciprocal %16 {approx = true} : vector<8x1xf32> -> vector<8x1xf32>
    %18 = vector.broadcast %17 : vector<8x1xf32> to vector<8x8xf32>
    %19 = arith.mulf %14, %18 : vector<8x8xf32>
    %20 = vector.shape_cast %19 : vector<8x8xf32> to vector<8x8x1xf32>
    %21 = vector.broadcast %20 : vector<8x8x1xf32> to vector<8x8x32xf32>
    %22 = arith.mulf %21, %1 : vector<8x8x32xf32>
    %cst_9 = arith.constant dense<0.000000e+00> : vector<8x32xf32>
    %23 = vector.multi_reduction <add>, %22, %cst_9 [1] : vector<8x8x32xf32> to vector<8x32xf32>
    %c0_10 = arith.constant 0 : index
    %c0_11 = arith.constant 0 : index
    %24 = vector.load %arg4[%c0_10, %c0_11] : memref<32x32xf32, #tpu.memory_space<vmem>>, vector<32x32xf32>
    %cst_12 = arith.constant dense<0.000000e+00> : vector<8x32xf32>
    %25 = tpu.matmul %23, %24, %cst_12 {dimension_numbers = #tpu.dot_dimension_numbers<[1], [0], [0], [1], [0, 0, 1, 1], [], []>} : vector<8x32xf32>, vector<32x32xf32>, vector<8x32xf32> -> vector<8x32xf32>
    %26 = arith.addf %25, %5 : vector<8x32xf32>
    %27 = math.tanh %26 : vector<8x32xf32>
    %c0_13 = arith.constant 0 : index
    %c0_14 = arith.constant 0 : index
    %28 = vector.load %arg5[%c0_13, %c0_14] : memref<8x32xf32, #tpu.memory_space<vmem>>, vector<8x32xf32>
    tpu.vector_store %arg5[%c0_13, %c0_14], %23 {strides = array<i32>} : memref<8x32xf32, #tpu.memory_space<vmem>>, vector<8x32xf32>,
    %c0_15 = arith.constant 0 : index
    %c0_16 = arith.constant 0 : index
    %29 = vector.load %arg6[%c0_15, %c0_16] : memref<8x32xf32, #tpu.memory_space<vmem>>, vector<8x32xf32>
    tpu.vector_store %arg6[%c0_15, %c0_16], %27 {strides = array<i32>} : memref<8x32xf32, #tpu.memory_space<vmem>>, vector<8x32xf32>,
    %c0_17 = arith.constant 0 : index
    %c0_18 = arith.constant 0 : index
    %30 = vector.load %arg7[%c0_17, %c0_18] : memref<8x8xf32, #tpu.memory_space<vmem>>, vector<8x8xf32>
    tpu.vector_store %arg7[%c0_17, %c0_18], %19 {strides = array<i32>} : memref<8x8xf32, #tpu.memory_space<vmem>>, vector<8x8xf32>,
    return
  }
  func.func @transform_0(%arg0: i32) -> (i32, i32) {
    %c0_i32 = arith.constant 0 : i32
    %c0_i32_0 = arith.constant 0 : i32
    return %arg0, %c0_i32 : i32, i32
  }
  func.func @transform_1(%arg0: i32) -> (i32, i32, i32) {
    %c0_i32 = arith.constant 0 : i32
    %c0_i32_0 = arith.constant 0 : i32
    %c0_i32_1 = arith.constant 0 : i32
    return %arg0, %c0_i32, %c0_i32_0 : i32, i32, i32
  }
  func.func @transform_2(%arg0: i32) -> (i32, i32) {
    %c0_i32 = arith.constant 0 : i32
    %c0_i32_0 = arith.constant 0 : i32
    %c0_i32_1 = arith.constant 0 : i32
    return %c0_i32, %c0_i32_0 : i32, i32
  }
  func.func @transform_3(%arg0: i32) -> (i32, i32) {
    %c0_i32 = arith.constant 0 : i32
    %c0_i32_0 = arith.constant 0 : i32
    %c0_i32_1 = arith.constant 0 : i32
    return %c0_i32, %c0_i32_0 : i32, i32
  }
  func.func @transform_4(%arg0: i32) -> (i32, i32) {
    %c0_i32 = arith.constant 0 : i32
    %c0_i32_0 = arith.constant 0 : i32
    return %arg0, %c0_i32 : i32, i32
  }
  func.func @transform_5(%arg0: i32) -> (i32, i32) {
    %c0_i32 = arith.constant 0 : i32
    %c0_i32_0 = arith.constant 0 : i32
    return %arg0, %c0_i32 : i32, i32
  }
  func.func @transform_6(%arg0: i32) -> (i32, i32) {
    %c0_i32 = arith.constant 0 : i32
    %c0_i32_0 = arith.constant 0 : i32
    return %arg0, %c0_i32 : i32, i32
  }
}

</mosaic_0001>

<bundles_post_ra>
// kernel: tpu_custom_call.1
= control target key start
LH: loop header
LB: loop body
LE: loop exit
PB: predicated region body
PF: predicated region fallthrough
CT: control target
= control target key end

     0   :  { %12 = vsyncpa [#allocation3], 0  ;;  %s1298_s0 = inlined_call_operand.hbm [shape: f32[8,32], index: 0, kind: input, shape index: {}]   ;;  %s1299_s1 = inlined_call_operand.hbm [shape: f32[8,8,32], index: 1, kind: input, shape index: {}]   ;;  %s1300_s2 = inlined_call_operand.hbm [shape: f32[32,64], index: 2, kind: input, shape index: {}]   ;;  %s1301_s3 = inlined_call_operand.hbm [shape: f32[32,32], index: 3, kind: input, shape index: {}]   ;;  %s1302_s4 = inlined_call_operand.hbm [shape: f32[8,32], index: 4, kind: output, shape index: {0}]   ;;  %s1303_s5 = inlined_call_operand.hbm [shape: f32[8,32], index: 5, kind: output, shape index: {1}]   ;;  %s1304_s6 = inlined_call_operand.hbm [shape: f32[8,8], index: 6, kind: output, shape index: {2}]  }
   0x1   :  { %13 = vsyncpa [#allocation6], 0 }
   0x2   :  { %14 = vsyncpa [#allocation9], 0 }
   0x3   :  { %15 = vsyncpa [#allocation4], 0 }
   0x4   :  { %16 = vsyncpa [#allocation12], 0  ;;  %s1042_s21 = smov [#allocation5]  }
   0x5   :  { %s32_s22 = sshll.u32 %s1042_s21, 4  ;;  %s33_s22 = int_to_ptr.vmem [resolvable:$true] %s32_s22 }
   0x6   :  { %s900_s23 = scalar_lea.vmem %s33_s22, 1024  ;;  %p905_p1 = scmp.lt.s32.totalorder %s33_s22, %s33_s22 }
   0x7   :  { %p901_p0 = scmp.ne.s32.totalorder %s33_s22, %s900_s23  ;;  %p906_p2 = scmp.lt.s32.totalorder %s900_s23, %s900_s23 }
   0x9   :  { %p907_p3 = por %p906_p2, %p905_p1 }
   0xb   :  { %p908_p4 = pnand %p907_p3, %p901_p0 }
   0xd   :  { %911 = shalt.err (!%p908_p4)
}
   0xe   :  { %s1043_s24 = smov 128   ;;  %s1044_s25 = smov 8  }
   0xf   :  { %38 = dma.hbm_to_vmem [thread:$0]  %s1299_s1, 1024, %s33_s22, [#allocation6], %s1043_s24, %s1043_s24, %s1044_s25  }
  0x10   :  { %s1045_s28 = smov [#allocation2]   ;;  %s1046_s30 = smov [#allocation7]  }
  0x11   :  { %s23_s29 = sshll.u32 %s1045_s28, 4  ;;  %s44_s7 = sshll.u32 %s1046_s30, 4  ;;  %s24_s29 = int_to_ptr.vmem [resolvable:$true] %s23_s29  ;;  %s45_s7 = int_to_ptr.vmem [resolvable:$true] %s44_s7 }
  0x12   :  { %s920_s8 = scalar_lea.vmem %s24_s29, 128  ;;  %p925_p6 = scmp.lt.s32.totalorder %s24_s29, %s24_s29 }
  0x13   :  { %p921_p5 = scmp.ne.s32.totalorder %s24_s29, %s920_s8  ;;  %p926_p7 = scmp.lt.s32.totalorder %s920_s8, %s920_s8 }
  0x15   :  { %p927_p8 = por %p926_p7, %p925_p6 }
  0x17   :  { %p928_p9 = pnand %p927_p8, %p921_p5 }
  0x19   :  { %931 = shalt.err (!%p928_p9)
}
  0x1a   :  { %26 = dma.hbm_to_vmem [thread:$0]  %s1298_s0, 128, %s24_s29, [#allocation3]  }
  0x1b   :  { %s940_s11 = scalar_lea.vmem %s45_s7, 512  ;;  %p945_p11 = scmp.lt.s32.totalorder %s45_s7, %s45_s7 }
  0x1c   :  { %p941_p10 = scmp.ne.s32.totalorder %s45_s7, %s940_s11  ;;  %p946_p12 = scmp.lt.s32.totalorder %s940_s11, %s940_s11 }
  0x1e   :  { %p947_p13 = por %p946_p12, %p945_p11 }
  0x20   :  { %p948_p0 = pnand %p947_p13, %p941_p10 }
  0x22   :  { %951 = shalt.err (!%p948_p0)
}
  0x23   :  { %50 = dma.hbm_to_vmem [thread:$0]  %s1300_s2, 512, %s45_s7, [#allocation6], %s1043_s24, %s1043_s24, %s1044_s25  }
  0x24   :  { %s1047_s13 = smov [#allocation8]  }
  0x25   :  { %s56_s14 = sshll.u32 %s1047_s13, 4  ;;  %s57_s14 = int_to_ptr.vmem [resolvable:$true] %s56_s14 }
  0x26   :  { %s960_s15 = scalar_lea.vmem %s57_s14, 512  ;;  %p965_p2 = scmp.lt.s32.totalorder %s57_s14, %s57_s14 }
  0x27   :  { %p961_p1 = scmp.ne.s32.totalorder %s57_s14, %s960_s15  ;;  %p966_p3 = scmp.lt.s32.totalorder %s960_s15, %s960_s15 }
  0x29   :  { %p967_p4 = por %p966_p3, %p965_p2 }
  0x2b   :  { %p968_p5 = pnand %p967_p4, %p961_p1 }
  0x2d   :  { %971 = shalt.err (!%p968_p5)
}
  0x2e   :  { %62 = dma.hbm_to_vmem [thread:$0]  %s1301_s3, 512, %s57_s14, [#allocation9], %s1043_s24, %s1043_s24, %s1044_s25  }
  0x2f   :  { %1032 = dma.done.wait [#allocation3], 128  }
  0x30   :  { %1033 = vsyncadd [#allocation3], 4294967168 }
  0x31   :  { %1034 = dma.done.wait [#allocation6], 1536  }
  0x32   :  { %1035 = vsyncadd [#allocation6], 4294965760 }
  0x33   :  { %1036 = dma.done.wait [#allocation9], 512  }
  0x34   :  { %1037 = vsyncadd [#allocation9], 4294966784  ;;  %v1048_v0 = vmov 0.0   ;;  %vm1049_vm0 = vmmov 0   ;;  %v87_v1 = vld [vmem:[#allocation7 + $0x18] sm:$0xff]  ;;  %v86_v2 = vld [vmem:[#allocation7 + $0x10] sm:$0xff]  ;;  %v167_v8 = vlaneseq }
  0x35   :  { %834 = vmatprep.subr.mxu0 %v1048_v0  ;;  %842 = vmatprep.mubr.msk.f32.mxu0 %vm1049_vm0, %v1048_v0  ;;  %v85_v3 = vld [vmem:[#allocation7 + $0x8] sm:$0xff]  ;;  %v84_v4 = vld [vmem:[#allocation7] sm:$0xff]  ;;  %v75_v5 = vld [vmem:[#allocation2] sm:$0xff]  ;;  %vm88_vm1 = vcmask 261120   ;;  %v1050_v6 = vmov 1966171168  }
  0x36   :  { %845 = vmatprep.subr.mxu1 %v1048_v0  ;;  %853 = vmatprep.mubr.msk.f32.mxu1 %vm1049_vm0, %v1048_v0  ;;  %v165_v7 = vunpack.c.l.s4 %v1050_v6  ;;  %v1120_v10 = vshrl.u32 %v167_v8, 7  ;;  %v1131_v20 = vld [vmem:[#allocation5] sm:$0xff]  ;;  %v1134_v25 = vld [vmem:[#allocation5 + $0x10] sm:$0xff]  ;;  %v1136_v26 = vld [vmem:[#allocation5 + $0x8] sm:$0xff]  ;;  %v293_v60 = vand.u32 127, %v167_v8  ;;  %vm326_vm2 = vcmask 1041409  }
  0x37   :  { %835 = vmatpush3.msra.mxu0 %v87_v1  ;;  %v1141_v32 = vld [vmem:[#allocation5 + $0x18] sm:$0xff]  ;;  %v1148_v40 = vld [vmem:[#allocation5 + $0x20] sm:$0xff]  ;;  %v1153_v45 = vld [vmem:[#allocation5 + $0x28] sm:$0xff]  ;;  %vm328_vm3 = vcmask 1042434   ;;  %vm330_vm4 = vcmask 1043459   ;;  %vm332_vm5 = vcmask 1044484  }
  0x38   :  { %836 = vmatprep.subr.mxu0 %v1048_v0  ;;  %v166_v9 = vunpack.c.0.s8 %v165_v7  ;;  %v1129_v15 = vsub.s32 0, %v1120_v10  ;;  %v1158_v49 = vld [vmem:[#allocation5 + $0x30] sm:$0xff]  ;;  %v1163_v53 = vld [vmem:[#allocation5 + $0x38] sm:$0xff]  ;;  %v1172_v62 = vsub.s32 %v293_v60, %v1120_v10  ;;  %vm334_vm6 = vcmask 1045509   ;;  %s1052_s2 = smov 96   ;;  %s1053_s3 = smov [#allocation10]  }
  0x39   :  { %837 = vmatpush3.msra.mxu0 %v86_v2  ;;  %vm336_vm7 = vcmask 1046534   ;;  %vm338_vm8 = vcmask 1047559   ;;  %vm341_vm9 = vcmask 64512   ;;  %s784_s17 = sshll.u32 %s1053_s3, 4  ;;  %s785_s17 = int_to_ptr.vmem [resolvable:$true] %s784_s17 }
  0x3a   :  { %838 = vmatprep.subr.mxu0 %v1048_v0  ;;  %v169_v11 = vsub.s32 %v166_v9, %v1120_v10  ;;  %s972_s18 = scalar_lea.vmem %s785_s17, 128  ;;  %p977_p7 = scmp.lt.s32.totalorder %s785_s17, %s785_s17 }
  0x3b   :  { %839 = vmatpush3.msra.mxu0 %v85_v3  ;;  %p973_p6 = scmp.ne.s32.totalorder %s785_s17, %s972_s18  ;;  %p978_p8 = scmp.lt.s32.totalorder %s972_s18, %s972_s18 }
  0x3c   :  { %840 = vmatprep.subr.mxu0 %v1048_v0 }
  0x3d   :  { %841 = vmatpush3.msra.mxu0 %v84_v4  ;;  %p979_p9 = por %p978_p8, %p977_p7 }
  0x3e   :  { %843 = vmatmul.mubr.msk.f32.vlgmr.msra.gmra.mxu0 %vm88_vm1, %v75_v5 }
  0x3f   :  { %p980_p10 = pnand %p979_p9, %p973_p6 }
  0xfe   :  { %v1123_v12 = vpop.f32.mrf.mxu0 }
  0xff   :  { %v163_v13 = vcombine.high %v1123_v12, %v1123_v12  ;;  %v170_v14 = vrot.slane %v1123_v12, %v169_v11 }
 0x100   :  { %v844_v16 = vpop.f32.mrf.mxu0 }
 0x101   :  { %v177_v17 = vrot.slane %v163_v13, %v169_v11  ;;  %v178_v18 = vcombine.high %v170_v14, %v170_v14  ;;  %v186_v19 = vrot.slane %v170_v14, %v169_v11 }
 0x103   :  { %v179_v21 = vcombine.high %v177_v17, %v177_v17  ;;  %v215_v22 = vrot.slane %v186_v19, %v1129_v15  ;;  %v208_v23 = vcombine.high %v186_v19, %v186_v19  ;;  %v200_v24 = vrot.slane %v178_v18, %v169_v11 }
 0x104   :  { %v193_v27 = vrot.slane %v177_v17, %v169_v11 }
 0x105   :  { %v252_v28 = vmul.f32 %v215_v22, %v1131_v20  ;;  %v223_v29 = vrot.slane %v208_v23, %v1129_v15  ;;  %v219_v30 = vrot.slane %v200_v24, %v1129_v15  ;;  %v210_v31 = vcombine.high %v200_v24, %v200_v24 }
 0x106   :  { %v231_v33 = vrot.slane %v193_v27, %v1129_v15  ;;  %v207_v34 = vrot.slane %v179_v21, %v169_v11  ;;  %v209_v35 = vcombine.high %v193_v27, %v193_v27 }
 0x107   :  { %v260_v36 = vsel %vm88_vm1, %v252_v28, 0.0  ;;  %v254_v37 = vmul.f32 %v223_v29, %v1134_v25  ;;  %v253_v38 = vmul.f32 %v219_v30, %v1136_v26  ;;  %v227_v39 = vrot.slane %v210_v31, %v1129_v15 }
 0x108   :  { %261 = vadd.xlane.f32.xlu0 %v260_v36  ;;  %v235_v43 = vrot.slane %v207_v34, %v1129_v15  ;;  %v211_v44 = vcombine.high %v207_v34, %v207_v34  ;;  %v256_v47 = vmul.f32 %v231_v33, %v1148_v40  ;;  %v239_v48 = vrot.slane %v209_v35, %v1129_v15 }
 0x109   :  { %v266_v41 = vsel %vm88_vm1, %v254_v37, 0.0  ;;  %v255_v42 = vmul.f32 %v227_v39, %v1141_v32  ;;  %v263_v46 = vsel %vm88_vm1, %v253_v38, 0.0  ;;  %v1051_v29 = vmov 0  }
 0x10a   :  { %267 = vadd.xlane.f32.xlu1 %v266_v41  ;;  %v257_v51 = vmul.f32 %v235_v43, %v1153_v45  ;;  %v243_v52 = vrot.slane %v211_v44, %v1129_v15  ;;  %v272_v54 = vsel %vm88_vm1, %v256_v47, 0.0  ;;  %v258_v55 = vmul.f32 %v239_v48, %v1158_v49  ;;  %871 = vset.pattern.permute.xlu0 %v1051_v29 }
 0x10b   :  { %v269_v50 = vsel %vm88_vm1, %v255_v42, 0.0  ;;  %870 = vset.pattern.permute.xlu1 %v1051_v29  ;;  %v352_v30 = vsub.s32 1, %v1120_v10  ;;  %v356_v31 = vsub.s32 2, %v1120_v10  ;;  %v360_v33 = vsub.s32 3, %v1120_v10 }
 0x10c   :  { %264 = vadd.xlane.f32.xlu0 %v263_v46  ;;  %v275_v56 = vsel %vm88_vm1, %v257_v51, 0.0  ;;  %v259_v57 = vmul.f32 %v243_v52, %v1163_v53  ;;  %v278_v58 = vsel %vm88_vm1, %v258_v55, 0.0  ;;  %v364_v38 = vsub.s32 4, %v1120_v10 }
 0x10d   :  { %v368_v47 = vsub.s32 5, %v1120_v10  ;;  %v372_v52 = vsub.s32 6, %v1120_v10 }
 0x10e   :  { %270 = vadd.xlane.f32.xlu1 %v269_v50  ;;  %v281_v59 = vsel %vm88_vm1, %v259_v57, 0.0  ;;  %v376_v57 = vsub.s32 7, %v1120_v10 }
 0x110   :  { %273 = vadd.xlane.f32.xlu0 %v272_v54 }
 0x112   :  { %276 = vadd.xlane.f32.xlu1 %v275_v56 }
 0x114   :  { %279 = vadd.xlane.f32.xlu0 %v278_v58 }
 0x116   :  { %282 = vadd.xlane.f32.xlu1 %v281_v59 }
 0x191   :  { %v262_v61 = vpop.xlane.xlu0 %261 }
 0x192   :  { %v297_v2 = vrot.slane %v262_v61, %v1172_v62 }
 0x193   :  { %v268_v63 = vpop.xlane.xlu1 %267 }
 0x194   :  { %v305_v4 = vrot.slane %v268_v63, %v1172_v62 }
 0x195   :  { %v265_v1 = vpop.xlane.xlu0 %264 }
 0x196   :  { %v301_v3 = vrot.slane %v265_v1, %v1172_v62 }
 0x197   :  { %v271_v5 = vpop.xlane.xlu1 %270 }
 0x198   :  { %v327_v6 = vsel %vm326_vm2, %v301_v3, %v297_v2  ;;  %v309_v7 = vrot.slane %v271_v5, %v1172_v62 }
 0x199   :  { %v329_v8 = vsel %vm328_vm3, %v305_v4, %v327_v6  ;;  %v274_v9 = vpop.xlane.xlu0 %273 }
 0x19a   :  { %v331_v11 = vsel %vm330_vm4, %v309_v7, %v329_v8  ;;  %v313_v13 = vrot.slane %v274_v9, %v1172_v62 }
 0x19b   :  { %v277_v14 = vpop.xlane.xlu1 %276 }
 0x19c   :  { %v333_v16 = vsel %vm332_vm5, %v313_v13, %v331_v11  ;;  %v317_v17 = vrot.slane %v277_v14, %v1172_v62 }
 0x19d   :  { %v280_v18 = vpop.xlane.xlu0 %279 }
 0x19e   :  { %v321_v19 = vrot.slane %v280_v18, %v1172_v62  ;;  %v335_v21 = vsel %vm334_vm6, %v317_v17, %v333_v16 }
 0x19f   :  { %v283_v22 = vpop.xlane.xlu1 %282 }
 0x1a0   :  { %v325_v23 = vrot.slane %v283_v22, %v1172_v62  ;;  %v337_v24 = vsel %vm336_vm7, %v321_v19, %v335_v21 }
 0x1a2   :  { %v339_v27 = vsel %vm338_vm8, %v325_v23, %v337_v24 }
 0x1a3   :  { %v342_v28 = vsel %vm341_vm9, %v339_v27, -inf }
 0x1a4   :  { %343 = vmax.xlane.f32.xlu0 %v342_v28 }
 0x22d   :  { %v344_v34 = vpop.xlane.xlu0 %343 }
 0x22e   :  { %v349_v35 = vrot.slane %v344_v34, %v1129_v15  ;;  %v353_v36 = vrot.slane %v344_v34, %v352_v30  ;;  %v357_v37 = vrot.slane %v344_v34, %v356_v31  ;;  %v361_v39 = vrot.slane %v344_v34, %v360_v33 }
 0x22f   :  { %v365_v48 = vrot.slane %v344_v34, %v364_v38  ;;  %v369_v54 = vrot.slane %v344_v34, %v368_v47  ;;  %v373_v58 = vrot.slane %v344_v34, %v372_v52 }
 0x230   :  { %v386_v41 = vsub.f32 %v262_v61, %v349_v35  ;;  %v387_v42 = vsub.f32 %v265_v1, %v353_v36  ;;  %v388_v43 = vsub.f32 %v268_v63, %v357_v37  ;;  %v389_v50 = vsub.f32 %v271_v5, %v361_v39 }
 0x231   :  { %v390_v55 = vsub.f32 %v274_v9, %v365_v48  ;;  %v391_v59 = vsub.f32 %v277_v14, %v369_v54  ;;  %v377_v61 = vrot.slane %v344_v34, %v376_v57  ;;  %v392_v63 = vsub.f32 %v280_v18, %v373_v58 }
 0x232   :  { %v394_v44 = vmul.f32 1.442695, %v386_v41  ;;  %v396_v46 = vmul.f32 1.442695, %v387_v42  ;;  %v398_v51 = vmul.f32 1.442695, %v388_v43 }
 0x233   :  { %v400_v56 = vmul.f32 1.442695, %v389_v50  ;;  %v402_v60 = vmul.f32 1.442695, %v390_v55  ;;  %v404_v1 = vmul.f32 1.442695, %v391_v59  ;;  %v393_v4 = vsub.f32 %v283_v22, %v377_v61 }
 0x234   :  { %872 = vpow2.f32 %v394_v44  ;;  %v406_v5 = vmul.f32 1.442695, %v392_v63 }
 0x235   :  { %874 = vpow2.f32 %v396_v46  ;;  %v408_v7 = vmul.f32 1.442695, %v393_v4 }
 0x236   :  { %876 = vpow2.f32 %v398_v51 }
 0x237   :  { %878 = vpow2.f32 %v400_v56 }
 0x238   :  { %880 = vpow2.f32 %v402_v60 }
 0x239   :  { %882 = vpow2.f32 %v404_v1 }
 0x23a   :  { %884 = vpow2.f32 %v406_v5 }
 0x23b   :  { %886 = vpow2.f32 %v408_v7  ;;  %v640_v7 = vld [vmem:[#allocation8 + $0x8] sm:$0xff] }
 0x241   :  { %v873_v2 = vpop.eup %872 }
 0x242   :  { %v875_v3 = vpop.eup %874  ;;  %419 = vperm.xlu1 %870, %v873_v2  }
 0x243   :  { %422 = vperm.xlu0 %871, %v875_v3   ;;  %v877_v6 = vpop.eup %876 }
 0x244   :  { %v879_v8 = vpop.eup %878 }
 0x245   :  { %v881_v9 = vpop.eup %880 }
 0x246   :  { %425 = vperm.xlu1 %870, %v877_v6   ;;  %v883_v11 = vpop.eup %882 }
 0x247   :  { %v885_v13 = vpop.eup %884 }
 0x248   :  { %v887_v14 = vpop.eup %886 }
 0x24a   :  { %428 = vperm.xlu1 %870, %v879_v8  }
 0x24e   :  { %431 = vperm.xlu1 %870, %v881_v9  }
 0x252   :  { %434 = vperm.xlu1 %870, %v883_v11  }
 0x256   :  { %437 = vperm.xlu1 %870, %v885_v13  }
 0x25a   :  { %440 = vperm.xlu1 %870, %v887_v14  }
 0x2bd   :  { %v420_v16 = vpop.permute.xlu1 %419 }
 0x2be   :  { %v423_v21 = vpop.permute.xlu0 %422  ;;  %v445_v24 = vrot.slane %v420_v16, %v1172_v62 }
 0x2bf   :  { %v449_v23 = vrot.slane %v423_v21, %v1172_v62 }
 0x2c1   :  { %v426_v17 = vpop.permute.xlu1 %425  ;;  %v474_v35 = vsel %vm326_vm2, %v449_v23, %v445_v24 }
 0x2c2   :  { %v453_v27 = vrot.slane %v426_v17, %v1172_v62 }
 0x2c4   :  { %v475_v37 = vsel %vm328_vm3, %v453_v27, %v474_v35 }
 0x2c5   :  { %v429_v18 = vpop.permute.xlu1 %428 }
 0x2c6   :  { %v457_v28 = vrot.slane %v429_v18, %v1172_v62 }
 0x2c8   :  { %v476_v41 = vsel %vm330_vm4, %v457_v28, %v475_v37 }
 0x2c9   :  { %v432_v19 = vpop.permute.xlu1 %431 }
 0x2ca   :  { %v461_v29 = vrot.slane %v432_v19, %v1172_v62 }
 0x2cc   :  { %v477_v42 = vsel %vm332_vm5, %v461_v29, %v476_v41 }
 0x2cd   :  { %v435_v22 = vpop.permute.xlu1 %434 }
 0x2ce   :  { %v465_v36 = vrot.slane %v435_v22, %v1172_v62 }
 0x2d0   :  { %v478_v44 = vsel %vm334_vm6, %v465_v36, %v477_v42 }
 0x2d1   :  { %v438_v34 = vpop.permute.xlu1 %437 }
 0x2d2   :  { %v469_v39 = vrot.slane %v438_v34, %v1172_v62 }
 0x2d4   :  { %v479_v48 = vsel %vm336_vm7, %v469_v39, %v478_v44 }
 0x2d5   :  { %v441_v43 = vpop.permute.xlu1 %440 }
 0x2d6   :  { %v473_v46 = vrot.slane %v441_v43, %v1172_v62 }
 0x2d8   :  { %v480_v50 = vsel %vm338_vm8, %v473_v46, %v479_v48 }
 0x2d9   :  { %v482_v51 = vsel %vm341_vm9, %v480_v50, 0.0 }
 0x2da   :  { %483 = vadd.xlane.f32.xlu1 %v482_v51 }
 0x2eb   :  { %658 = vrot.lane.b32.xlu1 %v1123_v12, %s1052_s2 }
 0x363   :  { %v484_v54 = vpop.xlane.xlu1 %483 }
 0x364   :  { %888 = vrcp.f32 %v484_v54 }
 0x371   :  { %v889_v55 = vpop.eup %888 }
 0x372   :  { %v490_v56 = vrot.slane %v889_v55, %v1129_v15  ;;  %v494_v59 = vrot.slane %v889_v55, %v352_v30  ;;  %v498_v61 = vrot.slane %v889_v55, %v356_v31  ;;  %v502_v1 = vrot.slane %v889_v55, %v360_v33 }
 0x373   :  { %v506_v4 = vrot.slane %v889_v55, %v364_v38  ;;  %v510_v30 = vrot.slane %v889_v55, %v368_v47  ;;  %v514_v31 = vrot.slane %v889_v55, %v372_v52  ;;  %v518_v33 = vrot.slane %v889_v55, %v376_v57  ;;  %v641_v38 = vld [vmem:[#allocation8 + $0x10] sm:$0xff]  ;;  %v639_v47 = vld [vmem:[#allocation8] sm:$0xff] }
 0x374   :  { %v527_v58 = vmul.f32 %v873_v2, %v490_v56  ;;  %v528_v60 = vmul.f32 %v875_v3, %v494_v59  ;;  %v529_v63 = vmul.f32 %v877_v6, %v498_v61  ;;  %v530_v12 = vmul.f32 %v879_v8, %v502_v1  ;;  %v642_v6 = vld [vmem:[#allocation8 + $0x18] sm:$0xff] }
 0x375   :  { %v531_v15 = vmul.f32 %v881_v9, %v506_v4  ;;  %v532_v2 = vmul.f32 %v883_v11, %v510_v30  ;;  %v533_v3 = vmul.f32 %v885_v13, %v514_v31  ;;  %v534_v5 = vmul.f32 %v887_v14, %v518_v33  ;;  %846 = vmatpush3.msra.mxu1 %v642_v6 }
 0x376   :  { %537 = vperm.xlu0 %871, %v527_v58   ;;  %847 = vmatprep.subr.mxu1 %v1048_v0 }
 0x377   :  { %848 = vmatpush3.msra.mxu1 %v641_v38 }
 0x378   :  { %849 = vmatprep.subr.mxu1 %v1048_v0 }
 0x379   :  { %850 = vmatpush3.msra.mxu1 %v640_v7 }
 0x37a   :  { %542 = vperm.xlu0 %871, %v528_v60   ;;  %851 = vmatprep.subr.mxu1 %v1048_v0 }
 0x37b   :  { %852 = vmatpush3.msra.mxu1 %v639_v47 }
 0x37e   :  { %547 = vperm.xlu0 %871, %v529_v63  }
 0x382   :  { %552 = vperm.xlu0 %871, %v530_v12  }
 0x386   :  { %557 = vperm.xlu0 %871, %v531_v15  }
 0x38a   :  { %562 = vperm.xlu0 %871, %v532_v2  }
 0x38e   :  { %567 = vperm.xlu0 %871, %v533_v3  }
 0x392   :  { %572 = vperm.xlu0 %871, %v534_v5  }
 0x3f1   :  { %v538_v52 = vpop.permute.xlu0 %537 }
 0x3f2   :  { %v575_v8 = vmul.f32 %v538_v52, %v1131_v20  ;;  %v740_v37 = vrot.slane %v538_v52, %v1172_v62 }
 0x3f4   :  { %v583_v14 = vsel %vm88_vm1, %v575_v8, 0.0 }
 0x3f5   :  { %v543_v10 = vpop.permute.xlu0 %542  ;;  %v584_v19 = vrot.slane %v583_v14, 4 }
 0x3f6   :  { %v576_v57 = vmul.f32 %v543_v10, %v1136_v26  ;;  %v744_v36 = vrot.slane %v543_v10, %v1172_v62 }
 0x3f8   :  { %v590_v13 = vsel %vm88_vm1, %v576_v57, 0.0  ;;  %v769_v55 = vsel %vm326_vm2, %v744_v36, %v740_v37 }
 0x3f9   :  { %v548_v9 = vpop.permute.xlu0 %547  ;;  %v591_v0 = vrot.slane %v590_v13, 4 }
 0x3fa   :  { %v577_v11 = vmul.f32 %v548_v9, %v1134_v25  ;;  %v585_v25 = vadd.f32 %v584_v19, %v583_v14  ;;  %v748_v41 = vrot.slane %v548_v9, %v1172_v62 }
 0x3fb   :  { %v592_v24 = vadd.f32 %v591_v0, %v590_v13 }
 0x3fc   :  { %v597_v16 = vsel %vm88_vm1, %v577_v11, 0.0  ;;  %v586_v43 = vrot.slane %v585_v25, 2  ;;  %v770_v60 = vsel %vm328_vm3, %v748_v41, %v769_v55 }
 0x3fd   :  { %v553_v17 = vpop.permute.xlu0 %552  ;;  %v598_v21 = vrot.slane %v597_v16, 4  ;;  %v593_v39 = vrot.slane %v592_v24, 2 }
 0x3fe   :  { %v578_v18 = vmul.f32 %v553_v17, %v1141_v32  ;;  %v752_v44 = vrot.slane %v553_v17, %v1172_v62  ;;  %v587_v1 = vadd.f32 %v586_v43, %v585_v25 }
 0x3ff   :  { %v599_v27 = vadd.f32 %v598_v21, %v597_v16  ;;  %v594_v59 = vadd.f32 %v593_v39, %v592_v24 }
 0x400   :  { %v604_v22 = vsel %vm88_vm1, %v578_v18, 0.0  ;;  %v771_v4 = vsel %vm330_vm4, %v752_v44, %v770_v60  ;;  %v588_v11 = vrot.slane %v587_v1, 1 }
 0x401   :  { %v605_v26 = vrot.slane %v604_v22, 4  ;;  %v558_v23 = vpop.permute.xlu0 %557  ;;  %v595_v7 = vrot.slane %v594_v59, 1 }
 0x402   :  { %v579_v20 = vmul.f32 %v558_v23, %v1148_v40  ;;  %v600_v40 = vrot.slane %v599_v27, 2  ;;  %v756_v50 = vrot.slane %v558_v23, %v1172_v62  ;;  %v589_v21 = vadd.f32 %v588_v11, %v587_v1 }
 0x403   :  { %v606_v29 = vadd.f32 %v605_v26, %v604_v22 }
 0x404   :  { %v611_v28 = vsel %vm88_vm1, %v579_v20, 0.0  ;;  %v601_v12 = vadd.f32 %v600_v40, %v599_v27  ;;  %v772_v2 = vsel %vm332_vm5, %v756_v50, %v771_v4 }
 0x405   :  { %v612_v34 = vrot.slane %v611_v28, 4  ;;  %v563_v35 = vpop.permute.xlu0 %562  ;;  %v607_v48 = vrot.slane %v606_v29, 2 }
 0x406   :  { %v580_v32 = vmul.f32 %v563_v35, %v1153_v45  ;;  %v760_v56 = vrot.slane %v563_v35, %v1172_v62  ;;  %v602_v57 = vrot.slane %v601_v12, 1 }
 0x407   :  { %v613_v42 = vadd.f32 %v612_v34, %v611_v28  ;;  %v608_v30 = vadd.f32 %v607_v48, %v606_v29 }
 0x408   :  { %v618_v46 = vsel %vm88_vm1, %v580_v32, 0.0  ;;  %v603_v19 = vadd.f32 %v602_v57, %v601_v12 }
 0x409   :  { %v619_v51 = vrot.slane %v618_v46, 4  ;;  %v568_v54 = vpop.permute.xlu0 %567  ;;  %v614_v45 = vrot.slane %v613_v42, 2  ;;  %v609_v13 = vrot.slane %v608_v30, 1 }
 0x40a   :  { %v581_v58 = vmul.f32 %v568_v54, %v1158_v49  ;;  %v764_v63 = vrot.slane %v568_v54, %v1172_v62  ;;  %v773_v49 = vsel %vm334_vm6, %v760_v56, %v772_v2 }
 0x40b   :  { %v620_v61 = vadd.f32 %v619_v51, %v618_v46  ;;  %v615_v5 = vadd.f32 %v614_v45, %v613_v42  ;;  %v610_v22 = vadd.f32 %v609_v13, %v608_v30 }
 0x40c   :  { %v625_v15 = vsel %vm88_vm1, %v581_v58, 0.0  ;;  %v774_v10 = vsel %vm336_vm7, %v764_v63, %v773_v49 }
 0x40d   :  { %v621_v31 = vrot.slane %v620_v61, 2  ;;  %v626_v3 = vrot.slane %v625_v15, 4  ;;  %v573_v33 = vpop.permute.xlu0 %572  ;;  %v616_v17 = vrot.slane %v615_v5, 1 }
 0x40e   :  { %v582_v6 = vmul.f32 %v573_v33, %v1163_v53  ;;  %v768_v38 = vrot.slane %v573_v33, %v1172_v62  ;;  %v596_v53 = vadd.f32 %v595_v7, %v594_v59 }
 0x40f   :  { %v622_v47 = vadd.f32 %v621_v31, %v620_v61  ;;  %v627_v52 = vadd.f32 %v626_v3, %v625_v15  ;;  %v617_v20 = vadd.f32 %v616_v17, %v615_v5 }
 0x410   :  { %v632_v8 = vsel %vm88_vm1, %v582_v6, 0.0  ;;  %v775_v9 = vsel %vm338_vm8, %v768_v38, %v774_v10  ;;  %v651_v24 = vsel %vm326_vm2, %v596_v53, %v589_v21 }
 0x411   :  { %v628_v14 = vrot.slane %v627_v52, 2  ;;  %v633_v16 = vrot.slane %v632_v8, 4  ;;  %777 = vst.msk [vmem:[#allocation13] sm:$0xff] %vm341_vm9, %v775_v9  ;;  %v623_v18 = vrot.slane %v622_v47, 1  ;;  %v652_v28 = vsel %vm328_vm3, %v603_v19, %v651_v24 }
 0x412   :  { %v653_v35 = vsel %vm330_vm4, %v610_v22, %v652_v28 }
 0x413   :  { %v629_v62 = vadd.f32 %v628_v14, %v627_v52  ;;  %v634_v0 = vadd.f32 %v633_v16, %v632_v8  ;;  %v624_v25 = vadd.f32 %v623_v18, %v622_v47  ;;  %v654_v36 = vsel %vm332_vm5, %v617_v20, %v653_v35 }
 0x415   :  { %v630_v26 = vrot.slane %v629_v62, 1  ;;  %v635_v23 = vrot.slane %v634_v0, 2  ;;  %v655_v37 = vsel %vm334_vm6, %v624_v25, %v654_v36 }
 0x417   :  { %v636_v27 = vadd.f32 %v635_v23, %v634_v0  ;;  %v631_v29 = vadd.f32 %v630_v26, %v629_v62 }
 0x419   :  { %v637_v34 = vrot.slane %v636_v27, 1  ;;  %v656_v39 = vsel %vm336_vm7, %v631_v29, %v655_v37 }
 0x41b   :  { %v638_v32 = vadd.f32 %v637_v34, %v636_v27 }
 0x41d   :  { %v657_v41 = vsel %vm338_vm8, %v638_v32, %v656_v39 }
 0x41e   :  { %854 = vmatmul.mubr.msk.f32.vlgmr.msra.gmra.mxu1 %vm88_vm1, %v657_v41  ;;  %735 = vst.msk [vmem:[#allocation10] sm:$0xff] %vm88_vm1, %v657_v41 }
 0x41f   :  { %983 = shalt.err (!%p980_p10)
}
 0x420   :  { %787 = dma.vmem_to_hbm [thread:$0]  %s785_s17, 128, %s1302_s4, [#allocation4]   ;;  %v659_v42 = vpop.permute.xlu1 %658 }
 0x421   :  { %s1054_s21 = smov [#allocation11]   ;;  %s1055_s23 = smov [#allocation13]  }
 0x422   :  { %s794_s22 = sshll.u32 %s1054_s21, 4  ;;  %s804_s24 = sshll.u32 %s1055_s23, 4  ;;  %s795_s22 = int_to_ptr.vmem [resolvable:$true] %s794_s22  ;;  %s805_s24 = int_to_ptr.vmem [resolvable:$true] %s804_s24 }
 0x423   :  { %s992_s25 = scalar_lea.vmem %s795_s22, 128  ;;  %p997_p12 = scmp.lt.s32.totalorder %s795_s22, %s795_s22 }
 0x424   :  { %p993_p11 = scmp.ne.s32.totalorder %s795_s22, %s992_s25  ;;  %p998_p13 = scmp.lt.s32.totalorder %s992_s25, %s992_s25 }
 0x426   :  { %p999_p0 = por %p998_p13, %p997_p12 }
 0x428   :  { %p1000_p1 = pnand %p999_p0, %p993_p11 }
 0x4de   :  { %v729_v43 = vpop.f32.mrf.mxu1 }
 0x4df   :  { %v730_v40 = vadd.f32 %v729_v43, %v659_v42 }
 0x4e0   :  { %v855_v44 = vpop.f32.mrf.mxu1 }
 0x4e1   :  { %890 = vtanh.f32 %v730_v40 }
 0x4ee   :  { %v891_v46 = vpop.eup %890 }
 0x4ef   :  { %736 = vst.msk [vmem:[#allocation11] sm:$0xff] %vm88_vm1, %v891_v46 }
 0x4f0   :  { %1003 = shalt.err (!%p1000_p1)
}
 0x4f1   :  { %797 = dma.vmem_to_hbm [thread:$0]  %s795_s22, 128, %s1303_s5, [#allocation12]  }
 0x4f2   :  { %s1012_s27 = scalar_lea.vmem %s805_s24, 128  ;;  %p1017_p3 = scmp.lt.s32.totalorder %s805_s24, %s805_s24 }
 0x4f3   :  { %p1013_p2 = scmp.ne.s32.totalorder %s805_s24, %s1012_s27  ;;  %p1018_p4 = scmp.lt.s32.totalorder %s1012_s27, %s1012_s27 }
 0x4f5   :  { %p1019_p5 = por %p1018_p4, %p1017_p3 }
 0x4f7   :  { %p1020_p6 = pnand %p1019_p5, %p1013_p2 }
 0x4f9   :  { %1023 = shalt.err (!%p1020_p6)
}
 0x4fa   :  { %807 = dma.vmem_to_hbm [thread:$0]  %s805_s24, 128, %s1304_s6, [#allocation12]  }
 0x4fb   :  { %1038 = dma.done.wait [#allocation4], 128  }
 0x4fc   :  { %1039 = vsyncadd [#allocation4], 4294967168 }
 0x4fd   :  { %1040 = dma.done.wait [#allocation12], 256  }
 0x4fe   :  { %1041 = vsyncadd [#allocation12], 4294967040 }
 0x4ff   :  { %817 = vsyncpa [#allocation3], 1 }
 0x500   :  { %818 = vsyncpa [#allocation6], 1 }
 0x501   :  { %819 = vsyncpa [#allocation9], 1 }
 0x502   :  { %820 = vsyncpa [#allocation4], 1 }
 0x503   :  { %821 = vsyncpa [#allocation12], 1 }

</bundles_post_ra>
